<compile_context>
chip_gen: v7x
topology: tpu7x:2x2x1
jax: 0.10.0
libtpu: 0.0.40
codegen_flags: <defaults>
</compile_context>

<pallas_src>
import functools

import jax
import jax.numpy as jnp
from jax.experimental import pallas as pl
from jax.experimental.pallas import tpu as pltpu


def _round_up(x, m):
    return (x + m - 1) // m * m


def _embed_add_kernel(ids_ref, x_ref, pos_ref, tab_ref, o_ref):
    # ids_ref: (TM, 1) int32; x_ref/pos_ref/o_ref: (TM, E); tab_ref: (V, E).
    ids = ids_ref[...]                                     # (TM, 1)
    tm = ids.shape[0]
    v = tab_ref.shape[0]

    # One-hot gather of embedding rows via the MXU: (TM, V) @ (V, E) -> (TM, E) f32.
    onehot = (jax.lax.broadcasted_iota(jnp.int32, (tm, v), 1) == ids)
    var_emb = jnp.dot(onehot.astype(tab_ref.dtype), tab_ref[...],
                      preferred_element_type=jnp.float32)

    out = x_ref[...].astype(jnp.float32) + var_emb + pos_ref[...].astype(jnp.float32)

    # Dropout (eval mode): identity.
    o_ref[...] = out.astype(o_ref.dtype)


@functools.partial(jax.jit, static_argnames=("block_rows",))
def bert_embedding(x, variable_seq, pos_emb, table, *, block_rows=256):
    """x: (..., E); variable_seq: (...) int ids; pos_emb broadcastable to x; table: (V, E)."""
    e = x.shape[-1]
    v = table.shape[0]
    lead = x.shape[:-1]

    xf = x.reshape(-1, e)
    posf = jnp.broadcast_to(pos_emb, x.shape).reshape(-1, e)
    ids = variable_seq.reshape(-1).astype(jnp.int32)
    n = xf.shape[0]

    # Row tile: multiple of 8 sublanes, capped at block_rows; pad rows to a tile multiple.
    tm = min(block_rows, _round_up(n, 8))
    n_pad = _round_up(n, tm)
    if n_pad != n:
        pad = n_pad - n
        xf = jnp.pad(xf, ((0, pad), (0, 0)))
        posf = jnp.pad(posf, ((0, pad), (0, 0)))
        ids = jnp.pad(ids, (0, pad))
    ids2 = ids.reshape(n_pad, 1)

    grid = (n_pad // tm,)

    # Explicit VMEM budget: double-buffered x/pos/out tiles + ids tiles + resident table.
    act_bytes = jnp.dtype(x.dtype).itemsize
    tab_bytes = jnp.dtype(table.dtype).itemsize
    est = (3 * 2 * tm * e * max(act_bytes, 4)          # x, pos, out tiles (f32 compute)
           + 2 * tm * 128 * 4                          # ids tiles (lane-padded int32)
           + 2 * _round_up(v, 8) * _round_up(e, 128) * tab_bytes)
    vmem_limit = int(min(max(2 * est + (2 << 20), 16 << 20), 48 << 20))

    out = pl.pallas_call(
        _embed_add_kernel,
        out_shape=jax.ShapeDtypeStruct((n_pad, e), x.dtype),
        grid_spec=pltpu.PrefetchScalarGridSpec(
            num_scalar_prefetch=0,
            grid=grid,
            in_specs=[
                pl.BlockSpec((tm, 1), lambda i: (i, 0)),   # ids tile
                pl.BlockSpec((tm, e), lambda i: (i, 0)),   # x tile
                pl.BlockSpec((tm, e), lambda i: (i, 0)),   # pos_emb tile
                pl.BlockSpec((v, e), lambda i: (0, 0)),    # embedding table (constant)
            ],
            out_specs=pl.BlockSpec((tm, e), lambda i: (i, 0)),
        ),
        compiler_params=pltpu.CompilerParams(
            dimension_semantics=("parallel",),
            vmem_limit_bytes=vmem_limit),
    )(ids2, xf, posf, table)

    return out[:n].reshape(*lead, e)


def _reference(x, variable_seq, pos_emb, table):
    var_emb = table[variable_seq]
    return x + var_emb + pos_emb


if __name__ == "__main__":
    key = jax.random.PRNGKey(0)
    # Small but representative: embed dim is lane-dense (128); seq chosen so the
    # padded/tiled path (n=400 -> n_pad=512, grid=(2,)) is exercised.
    batch, seq, embed_size, var_len = 4, 100, 128, 16

    k = jax.random.split(key, 4)
    x = jax.random.normal(k[0], (batch, seq, embed_size), dtype=jnp.float32)
    variable_seq = jax.random.randint(k[1], (batch, seq), 0, var_len)
    pos_emb = jax.random.normal(k[2], (1, seq, embed_size), dtype=jnp.float32)
    table = jax.random.normal(k[3], (var_len, embed_size), dtype=jnp.float32)

    out = bert_embedding(x, variable_seq, pos_emb, table)
    out = jax.block_until_ready(out)

    ref = _reference(x, variable_seq, pos_emb, table)
    assert out.shape == (batch, seq, embed_size)
    assert jnp.allclose(out, ref, atol=1e-5, rtol=1e-5), "mismatch vs reference"
    print("KERNEL_OK")
</pallas_src>

<mosaic_0001>
module attributes {stable_mosaic.version = 11 : i64} {
  func.func @_embed_add_kernel(%arg0: i32, %arg1: memref<256x1xi32, #tpu.memory_space<vmem>>, %arg2: memref<256x128xf32, #tpu.memory_space<vmem>>, %arg3: memref<256x128xf32, #tpu.memory_space<vmem>>, %arg4: memref<16x128xf32, #tpu.memory_space<vmem>>, %arg5: memref<256x128xf32, #tpu.memory_space<vmem>>) attributes {dimension_semantics = [#tpu.dimension_semantics<parallel>], iteration_bounds = array<i64: 2>, scalar_prefetch = 0 : i64, scratch_operands = 0 : i64, tpu.core_type = #tpu.core_type<tc>, window_params = [{transform_indices = @transform_0, window_bounds = array<i64: 256, 1>}, {transform_indices = @transform_1, window_bounds = array<i64: 256, 128>}, {transform_indices = @transform_2, window_bounds = array<i64: 256, 128>}, {pipeline_mode = #tpu.pipeline_mode<synchronous>, transform_indices = @transform_3, window_bounds = array<i64: 16, 128>}, {transform_indices = @transform_4, window_bounds = array<i64: 256, 128>}]} {
    %c0 = arith.constant 0 : index
    %c0_0 = arith.constant 0 : index
    %0 = vector.load %arg1[%c0, %c0_0] : memref<256x1xi32, #tpu.memory_space<vmem>>, vector<256x1xi32>
    %1 = tpu.iota {dimensions = array<i32: 1>} : vector<256x16xi32>
    %2 = vector.broadcast %0 : vector<256x1xi32> to vector<256x16xi32>
    %3 = arith.cmpi eq, %1, %2 : vector<256x16xi32>
    %4 = arith.extui %3 : vector<256x16xi1> to vector<256x16xi32>
    %5 = arith.sitofp %4 : vector<256x16xi32> to vector<256x16xf32>
    %c0_1 = arith.constant 0 : index
    %c0_2 = arith.constant 0 : index
    %6 = vector.load %arg4[%c0_1, %c0_2] : memref<16x128xf32, #tpu.memory_space<vmem>>, vector<16x128xf32>
    %cst = arith.constant dense<0.000000e+00> : vector<256x128xf32>
    %7 = tpu.matmul %5, %6, %cst {dimension_numbers = #tpu.dot_dimension_numbers<[1], [0], [0], [1], [0, 0, 1, 1], [], []>} : vector<256x16xf32>, vector<16x128xf32>, vector<256x128xf32> -> vector<256x128xf32>
    %c0_3 = arith.constant 0 : index
    %c0_4 = arith.constant 0 : index
    %8 = vector.load %arg2[%c0_3, %c0_4] : memref<256x128xf32, #tpu.memory_space<vmem>>, vector<256x128xf32>
    %9 = arith.addf %8, %7 : vector<256x128xf32>
    %c0_5 = arith.constant 0 : index
    %c0_6 = arith.constant 0 : index
    %10 = vector.load %arg3[%c0_5, %c0_6] : memref<256x128xf32, #tpu.memory_space<vmem>>, vector<256x128xf32>
    %11 = arith.addf %9, %10 : vector<256x128xf32>
    %c0_7 = arith.constant 0 : index
    %c0_8 = arith.constant 0 : index
    %12 = vector.load %arg5[%c0_7, %c0_8] : memref<256x128xf32, #tpu.memory_space<vmem>>, vector<256x128xf32>
    tpu.vector_store %arg5[%c0_7, %c0_8], %11 {strides = array<i32>} : memref<256x128xf32, #tpu.memory_space<vmem>>, vector<256x128xf32>,
    return
  }
  func.func @transform_0(%arg0: i32) -> (i32, i32) {
    %c0_i32 = arith.constant 0 : i32
    %c0_i32_0 = arith.constant 0 : i32
    return %arg0, %c0_i32 : i32, i32
  }
  func.func @transform_1(%arg0: i32) -> (i32, i32) {
    %c0_i32 = arith.constant 0 : i32
    %c0_i32_0 = arith.constant 0 : i32
    return %arg0, %c0_i32 : i32, i32
  }
  func.func @transform_2(%arg0: i32) -> (i32, i32) {
    %c0_i32 = arith.constant 0 : i32
    %c0_i32_0 = arith.constant 0 : i32
    return %arg0, %c0_i32 : i32, i32
  }
  func.func @transform_3(%arg0: i32) -> (i32, i32) {
    %c0_i32 = arith.constant 0 : i32
    %c0_i32_0 = arith.constant 0 : i32
    %c0_i32_1 = arith.constant 0 : i32
    return %c0_i32, %c0_i32_0 : i32, i32
  }
  func.func @transform_4(%arg0: i32) -> (i32, i32) {
    %c0_i32 = arith.constant 0 : i32
    %c0_i32_0 = arith.constant 0 : i32
    return %arg0, %c0_i32 : i32, i32
  }
}

</mosaic_0001>

<bundles_post_ra>
// kernel: bert_embedding.1
= control target key start
LH: loop header
LB: loop body
LE: loop exit
PB: predicated region body
PF: predicated region fallthrough
CT: control target
= control target key end

     0   :  { %s1253_s15 = smov 0   ;;  %s1522_s0 = inlined_call_operand.vmem [shape: s32[512,1], index: 0, kind: input, shape index: {}]   ;;  %s1523_s1 = inlined_call_operand.vmem [shape: f32[512,128], index: 1, kind: input, shape index: {}]   ;;  %s1524_s2 = inlined_call_operand.vmem [shape: f32[512,128], index: 2, kind: input, shape index: {}]   ;;  %s1525_s3 = inlined_call_operand.vmem [shape: f32[16,128], index: 3, kind: input, shape index: {}]   ;;  %s1526_s4 = inlined_call_operand.vmem [shape: f32[512,128], index: 4, kind: output, shape index: {}]  }
   0x1 LB: > { %s1035_s16 = sadd.s32 4294967295, %s1224_s15   ;;  %p1039_p0 = scmp.ge.s32.totalorder %s1224_s15, 1  ;;  %s1224_s15 = sphi %s1253_s15, %s14_s15  }
   0x2   : > { %p185_p1 = scmp.lt.s32.totalorder %s1224_s15, 3 }
   0x4   : > { %p186_p2 = pnand %p1039_p0, %p185_p1 }
   0x5   : > { %s1040_s17 = sshll.u32 (!%p186_p2), %s1035_s16, 5  ;;  %v471_v0 = vld [vmem:[%s1525_s3] sm:$0xff] (!%p186_p2)  ;;  %v472_v1 = vld [vmem:[%s1525_s3 + $0x8] sm:$0xff] (!%p186_p2)  ;;  %v1226_v2 = vmov (!%p186_p2), 0   ;;  %v277_v36 = vlaneseq (!%p186_p2)  ;;  %vm473_vm0 = vcmask (!%p186_p2), 130048   ;;  %v1227_v40 = vmov (!%p186_p2), 0.0  }
   0x6   : > { %189 = sbr.rel (%p186_p2) target bundleno = 425 (0x1a9), region = 36  ;;  %1217 = vset.pattern.permute.xlu1 (!%p186_p2), %v1226_v2  ;;  %1216 = vset.pattern.permute.xlu0 (!%p186_p2), %v1226_v2  ;;  %p222_p3 = scmp.lt.s32.totalorder (!%p186_p2), %s1040_s17, 63  ;;  %v1200_v3 = vpack.c.bf16 (!%p186_p2), %v472_v1, %v471_v0 }
   0x7   : > { %v1307_v37 = vand.u32 (!%p186_p2), 127, %v277_v36 }
   0x8   : > { %1201 = vmatprep.subr.bf16.mxu0 (!%p186_p2), %v1200_v3  ;;  %1204 = vmatprep.subr.bf16.mxu1 (!%p186_p2), %v1200_v3 }
   0x9   : > { %1203 = vmatpush3.bf16.msra.mxu0 (!%p186_p2), %v1200_v3  ;;  %1205 = vmatpush3.bf16.msra.mxu1 (!%p186_p2), %v1200_v3 }
   0xd   : > { %s1528_s17 = smov (!%p222_p3, %s1040_s17), 63 }
   0xe   : > { %s1267_s22 = sshll.u32 %s1528_s17, 3 }
   0xf   : > { %s1273_s25 = scalar_lea.vmem %s1522_s0, %s1267_s22  ;;  %s1409_s28 = scalar_lea.vmem %s1523_s1, %s1267_s22 }
  0x10   : > { %v246_v4 = vld [vmem:[%s1273_s25 + $0x8] sm:$0xff]  ;;  %v245_v5 = vld [vmem:[%s1273_s25] sm:$0xff]  ;;  %v263_v8 = vld [vmem:[%s1273_s25 + $0x90] sm:$0xff]  ;;  %s1415_s5 = scalar_lea.vmem %s1524_s2, %s1267_s22  ;;  %s1425_s8 = scalar_lea.vmem %s1526_s4, %s1267_s22 }
  0x11   : > { %283 = vperm.xlu1 %1217, %v246_v4   ;;  %280 = vperm.xlu0 %1216, %v245_v5   ;;  %v262_v6 = vld [vmem:[%s1273_s25 + $0x88] sm:$0xff]  ;;  %v261_v7 = vld [vmem:[%s1273_s25 + $0x80] sm:$0xff]  ;;  %v247_v9 = vld [vmem:[%s1273_s25 + $0x10] sm:$0xff] }
  0x12   : > { %v264_v10 = vld [vmem:[%s1273_s25 + $0x98] sm:$0xff]  ;;  %v265_v12 = vld [vmem:[%s1273_s25 + $0xa0] sm:$0xff]  ;;  %v266_v14 = vld [vmem:[%s1273_s25 + $0xa8] sm:$0xff] }
  0x13   : > { %v248_v11 = vld [vmem:[%s1273_s25 + $0x18] sm:$0xff]  ;;  %v249_v13 = vld [vmem:[%s1273_s25 + $0x20] sm:$0xff]  ;;  %v250_v15 = vld [vmem:[%s1273_s25 + $0x28] sm:$0xff] }
  0x14   : > { %v267_v16 = vld [vmem:[%s1273_s25 + $0xb0] sm:$0xff]  ;;  %v268_v18 = vld [vmem:[%s1273_s25 + $0xb8] sm:$0xff]  ;;  %v269_v20 = vld [vmem:[%s1273_s25 + $0xc0] sm:$0xff] }
  0x15   : > { %331 = vperm.xlu1 %1217, %v262_v6   ;;  %328 = vperm.xlu0 %1216, %v261_v7   ;;  %v251_v17 = vld [vmem:[%s1273_s25 + $0x30] sm:$0xff]  ;;  %v252_v19 = vld [vmem:[%s1273_s25 + $0x38] sm:$0xff]  ;;  %v253_v21 = vld [vmem:[%s1273_s25 + $0x40] sm:$0xff] }
  0x16   : > { %v270_v22 = vld [vmem:[%s1273_s25 + $0xc8] sm:$0xff]  ;;  %v271_v24 = vld [vmem:[%s1273_s25 + $0xd0] sm:$0xff]  ;;  %v272_v26 = vld [vmem:[%s1273_s25 + $0xd8] sm:$0xff] }
  0x17   : > { %v254_v23 = vld [vmem:[%s1273_s25 + $0x48] sm:$0xff]  ;;  %v255_v25 = vld [vmem:[%s1273_s25 + $0x50] sm:$0xff]  ;;  %v256_v27 = vld [vmem:[%s1273_s25 + $0x58] sm:$0xff] }
  0x18   : > { %v273_v28 = vld [vmem:[%s1273_s25 + $0xe0] sm:$0xff]  ;;  %v274_v30 = vld [vmem:[%s1273_s25 + $0xe8] sm:$0xff]  ;;  %v275_v32 = vld [vmem:[%s1273_s25 + $0xf0] sm:$0xff] }
  0x19   : > { %334 = vperm.xlu1 %1217, %v263_v8   ;;  %286 = vperm.xlu0 %1216, %v247_v9   ;;  %v257_v29 = vld [vmem:[%s1273_s25 + $0x60] sm:$0xff]  ;;  %v258_v31 = vld [vmem:[%s1273_s25 + $0x68] sm:$0xff]  ;;  %v259_v33 = vld [vmem:[%s1273_s25 + $0x70] sm:$0xff] }
  0x1a   : > { %v276_v34 = vld [vmem:[%s1273_s25 + $0xf8] sm:$0xff] }
  0x1b   : > { %v260_v35 = vld [vmem:[%s1273_s25 + $0x78] sm:$0xff] }
  0x1d   : > { %337 = vperm.xlu1 %1217, %v264_v10   ;;  %289 = vperm.xlu0 %1216, %v248_v11  }
  0x21   : > { %340 = vperm.xlu1 %1217, %v265_v12   ;;  %292 = vperm.xlu0 %1216, %v249_v13  }
  0x25   : > { %343 = vperm.xlu1 %1217, %v266_v14   ;;  %295 = vperm.xlu0 %1216, %v250_v15  }
  0x29   : > { %346 = vperm.xlu1 %1217, %v267_v16   ;;  %298 = vperm.xlu0 %1216, %v251_v17  }
  0x2d   : > { %349 = vperm.xlu1 %1217, %v268_v18   ;;  %301 = vperm.xlu0 %1216, %v252_v19  }
  0x31   : > { %352 = vperm.xlu1 %1217, %v269_v20   ;;  %304 = vperm.xlu0 %1216, %v253_v21  }
  0x35   : > { %355 = vperm.xlu1 %1217, %v270_v22   ;;  %307 = vperm.xlu0 %1216, %v254_v23  }
  0x39   : > { %358 = vperm.xlu1 %1217, %v271_v24   ;;  %310 = vperm.xlu0 %1216, %v255_v25  }
  0x3d   : > { %361 = vperm.xlu1 %1217, %v272_v26   ;;  %313 = vperm.xlu0 %1216, %v256_v27  }
  0x41   : > { %364 = vperm.xlu1 %1217, %v273_v28   ;;  %316 = vperm.xlu0 %1216, %v257_v29  }
  0x45   : > { %367 = vperm.xlu1 %1217, %v274_v30   ;;  %319 = vperm.xlu0 %1216, %v258_v31  }
  0x49   : > { %370 = vperm.xlu1 %1217, %v275_v32   ;;  %322 = vperm.xlu0 %1216, %v259_v33  }
  0x4d   : > { %373 = vperm.xlu1 %1217, %v276_v34   ;;  %325 = vperm.xlu0 %1216, %v260_v35  }
  0x90   : > { %v284_v38 = vpop.permute.xlu1 %283  ;;  %v281_v39 = vpop.permute.xlu0 %280 }
  0x91   : > { %vm376_vm1 = vcmp.eq.s32.totalorder %v1307_v37, %v284_v38  ;;  %vm375_vm2 = vcmp.eq.s32.totalorder %v1307_v37, %v281_v39 }
  0x92   : > { %v1049_v41 = vsel %vm376_vm1, 1.0, %v1227_v40  ;;  %v1048_v42 = vsel %vm375_vm2, 1.0, %v1227_v40 }
  0x93   : > { %1152 = vmatprep.mubr.msk.f32.mxu0 %vm473_vm0, %v1048_v42  ;;  %v860_v42 = vld [vmem:[%s1415_s5 + $0x8] sm:$0xff] }
  0x94   : > { %v332_v43 = vpop.permute.xlu1 %331  ;;  %1153 = vmatmul.mubr.msk.f32.vlgmr.msra.gmra.mrb[0].mxu0 %vm473_vm0, %v1049_v41  ;;  %v329_v44 = vpop.permute.xlu0 %328 }
  0x95   : > { %vm392_vm3 = vcmp.eq.s32.totalorder %v1307_v37, %v332_v43  ;;  %vm391_vm4 = vcmp.eq.s32.totalorder %v1307_v37, %v329_v44 }
  0x96   : > { %v1065_v45 = vsel %vm392_vm3, 1.0, %v1227_v40  ;;  %v1064_v46 = vsel %vm391_vm4, 1.0, %v1227_v40 }
  0x97   : > { %1176 = vmatprep.mubr.msk.f32.mxu1 %vm473_vm0, %v1064_v46 }
  0x98   : > { %v335_v47 = vpop.permute.xlu1 %334  ;;  %1177 = vmatmul.mubr.msk.f32.vlgmr.msra.gmra.mrb[0].mxu1 %vm473_vm0, %v1065_v45  ;;  %v287_v48 = vpop.permute.xlu0 %286  ;;  %v859_v45 = vld [vmem:[%s1415_s5] sm:$0xff] }
  0x99   : > { %vm393_vm5 = vcmp.eq.s32.totalorder %v1307_v37, %v335_v47  ;;  %vm377_vm6 = vcmp.eq.s32.totalorder %v1307_v37, %v287_v48  ;;  %v812_v47 = vld [vmem:[%s1409_s28 + $0x88] sm:$0xff] }
  0x9a   : > { %v1066_v49 = vsel %vm393_vm5, 1.0, %v1227_v40  ;;  %v1050_v50 = vsel %vm377_vm6, 1.0, %v1227_v40 }
  0x9b   : > { %1155 = vmatprep.mubr.msk.f32.mxu0 %vm473_vm0, %v1050_v50  ;;  %1179 = vmatprep.mubr.msk.f32.mxu1 %vm473_vm0, %v1066_v49  ;;  %v811_v49 = vld [vmem:[%s1409_s28 + $0x80] sm:$0xff] }
  0x9c   : > { %v338_v51 = vpop.permute.xlu1 %337  ;;  %v290_v52 = vpop.permute.xlu0 %289 }
  0x9d   : > { %vm394_vm7 = vcmp.eq.s32.totalorder %v1307_v37, %v338_v51  ;;  %vm378_vm8 = vcmp.eq.s32.totalorder %v1307_v37, %v290_v52  ;;  %v876_v52 = vld [vmem:[%s1415_s5 + $0x88] sm:$0xff] }
  0x9e   : > { %v1067_v53 = vsel %vm394_vm7, 1.0, %v1227_v40  ;;  %v1051_v54 = vsel %vm378_vm8, 1.0, %v1227_v40 }
  0x9f   : > { %1156 = vmatmul.mubr.msk.f32.gmra.mrb[2].mxu0 %vm473_vm0, %v1051_v54  ;;  %1180 = vmatmul.mubr.msk.f32.gmra.mrb[2].mxu1 %vm473_vm0, %v1067_v53 }
  0xa0   : > { %v341_v55 = vpop.permute.xlu1 %340  ;;  %v293_v56 = vpop.permute.xlu0 %292 }
  0xa1   : > { %vm395_vm9 = vcmp.eq.s32.totalorder %v1307_v37, %v341_v55  ;;  %vm379_vm10 = vcmp.eq.s32.totalorder %v1307_v37, %v293_v56  ;;  %v875_v55 = vld [vmem:[%s1415_s5 + $0x80] sm:$0xff] }
  0xa2   : > { %v1068_v57 = vsel %vm395_vm9, 1.0, %v1227_v40  ;;  %v1052_v58 = vsel %vm379_vm10, 1.0, %v1227_v40 }
  0xa3   : > { %1158 = vmatprep.mubr.msk.f32.mxu0 %vm473_vm0, %v1052_v58  ;;  %1182 = vmatprep.mubr.msk.f32.mxu1 %vm473_vm0, %v1068_v57 }
  0xa4   : > { %v344_v59 = vpop.permute.xlu1 %343  ;;  %v296_v60 = vpop.permute.xlu0 %295 }
  0xa5   : > { %vm396_vm11 = vcmp.eq.s32.totalorder %v1307_v37, %v344_v59  ;;  %vm380_vm12 = vcmp.eq.s32.totalorder %v1307_v37, %v296_v60  ;;  %v798_v59 = vld [vmem:[%s1409_s28 + $0x18] sm:$0xff] }
  0xa6   : > { %v1069_v61 = vsel %vm396_vm11, 1.0, %v1227_v40  ;;  %v1053_v62 = vsel %vm380_vm12, 1.0, %v1227_v40  ;;  %v814_v60 = vld [vmem:[%s1409_s28 + $0x98] sm:$0xff] }
  0xa7   : > { %1159 = vmatmul.mubr.msk.f32.gmra.mrb[4].mxu0 %vm473_vm0, %v1053_v62  ;;  %1183 = vmatmul.mubr.msk.f32.gmra.mrb[4].mxu1 %vm473_vm0, %v1069_v61  ;;  %v797_v61 = vld [vmem:[%s1409_s28 + $0x10] sm:$0xff] }
  0xa8   : > { %v347_v63 = vpop.permute.xlu1 %346  ;;  %v299_v0 = vpop.permute.xlu0 %298  ;;  %v813_v62 = vld [vmem:[%s1409_s28 + $0x90] sm:$0xff] }
  0xa9   : > { %vm397_vm13 = vcmp.eq.s32.totalorder %v1307_v37, %v347_v63  ;;  %vm381_vm14 = vcmp.eq.s32.totalorder %v1307_v37, %v299_v0  ;;  %v862_v0 = vld [vmem:[%s1415_s5 + $0x18] sm:$0xff] }
  0xaa   : > { %v1070_v1 = vsel %vm397_vm13, 1.0, %v1227_v40  ;;  %v1054_v2 = vsel %vm381_vm14, 1.0, %v1227_v40 }
  0xab   : > { %1161 = vmatprep.mubr.msk.f32.mxu0 %vm473_vm0, %v1054_v2  ;;  %1185 = vmatprep.mubr.msk.f32.mxu1 %vm473_vm0, %v1070_v1  ;;  %v878_v2 = vld [vmem:[%s1415_s5 + $0x98] sm:$0xff] }
  0xac   : > { %v350_v3 = vpop.permute.xlu1 %349  ;;  %v302_v4 = vpop.permute.xlu0 %301 }
  0xad   : > { %vm398_vm15 = vcmp.eq.s32.totalorder %v1307_v37, %v350_v3  ;;  %vm382_vm1 = vcmp.eq.s32.totalorder %v1307_v37, %v302_v4 }
  0xae   : > { %v1071_v5 = vsel %vm398_vm15, 1.0, %v1227_v40  ;;  %v1055_v6 = vsel %vm382_vm1, 1.0, %v1227_v40 }
  0xaf   : > { %1162 = vmatmul.mubr.msk.f32.gmra.mrb[6].mxu0 %vm473_vm0, %v1055_v6  ;;  %1186 = vmatmul.mubr.msk.f32.gmra.mrb[6].mxu1 %vm473_vm0, %v1071_v5  ;;  %v861_v6 = vld [vmem:[%s1415_s5 + $0x10] sm:$0xff] }
  0xb0   : > { %v353_v7 = vpop.permute.xlu1 %352  ;;  %v305_v8 = vpop.permute.xlu0 %304 }
  0xb1   : > { %vm399_vm2 = vcmp.eq.s32.totalorder %v1307_v37, %v353_v7  ;;  %vm383_vm3 = vcmp.eq.s32.totalorder %v1307_v37, %v305_v8  ;;  %v877_v8 = vld [vmem:[%s1415_s5 + $0x90] sm:$0xff] }
  0xb2   : > { %v1072_v9 = vsel %vm399_vm2, 1.0, %v1227_v40  ;;  %v1056_v10 = vsel %vm383_vm3, 1.0, %v1227_v40 }
  0xb3   : > { %1164 = vmatprep.mubr.msk.f32.mxu0 %vm473_vm0, %v1056_v10  ;;  %1188 = vmatprep.mubr.msk.f32.mxu1 %vm473_vm0, %v1072_v9 }
  0xb4   : > { %v356_v11 = vpop.permute.xlu1 %355  ;;  %v308_v12 = vpop.permute.xlu0 %307 }
  0xb5   : > { %vm400_vm4 = vcmp.eq.s32.totalorder %v1307_v37, %v356_v11  ;;  %vm384_vm5 = vcmp.eq.s32.totalorder %v1307_v37, %v308_v12 }
  0xb6   : > { %v1073_v13 = vsel %vm400_vm4, 1.0, %v1227_v40  ;;  %v1057_v14 = vsel %vm384_vm5, 1.0, %v1227_v40 }
  0xb7   : > { %1165 = vmatmul.mubr.msk.f32.gmra.mrb[8].mxu0 %vm473_vm0, %v1057_v14  ;;  %1189 = vmatmul.mubr.msk.f32.gmra.mrb[8].mxu1 %vm473_vm0, %v1073_v13 }
  0xb8   : > { %v359_v15 = vpop.permute.xlu1 %358  ;;  %v311_v16 = vpop.permute.xlu0 %310 }
  0xb9   : > { %vm401_vm6 = vcmp.eq.s32.totalorder %v1307_v37, %v359_v15  ;;  %vm385_vm7 = vcmp.eq.s32.totalorder %v1307_v37, %v311_v16  ;;  %v800_v15 = vld [vmem:[%s1409_s28 + $0x28] sm:$0xff] }
  0xba   : > { %v1074_v17 = vsel %vm401_vm6, 1.0, %v1227_v40  ;;  %v1058_v18 = vsel %vm385_vm7, 1.0, %v1227_v40  ;;  %v816_v16 = vld [vmem:[%s1409_s28 + $0xa8] sm:$0xff] }
  0xbb   : > { %1167 = vmatprep.mubr.msk.f32.mxu0 %vm473_vm0, %v1058_v18  ;;  %1191 = vmatprep.mubr.msk.f32.mxu1 %vm473_vm0, %v1074_v17  ;;  %v799_v17 = vld [vmem:[%s1409_s28 + $0x20] sm:$0xff] }
  0xbc   : > { %v362_v19 = vpop.permute.xlu1 %361  ;;  %v314_v20 = vpop.permute.xlu0 %313  ;;  %v815_v18 = vld [vmem:[%s1409_s28 + $0xa0] sm:$0xff] }
  0xbd   : > { %vm402_vm8 = vcmp.eq.s32.totalorder %v1307_v37, %v362_v19  ;;  %vm386_vm9 = vcmp.eq.s32.totalorder %v1307_v37, %v314_v20  ;;  %v864_v20 = vld [vmem:[%s1415_s5 + $0x28] sm:$0xff] }
  0xbe   : > { %v1075_v21 = vsel %vm402_vm8, 1.0, %v1227_v40  ;;  %v1059_v22 = vsel %vm386_vm9, 1.0, %v1227_v40 }
  0xbf   : > { %1168 = vmatmul.mubr.msk.f32.gmra.mrb[10].mxu0 %vm473_vm0, %v1059_v22  ;;  %1192 = vmatmul.mubr.msk.f32.gmra.mrb[10].mxu1 %vm473_vm0, %v1075_v21  ;;  %v880_v22 = vld [vmem:[%s1415_s5 + $0xa8] sm:$0xff] }
  0xc0   : > { %v365_v23 = vpop.permute.xlu1 %364  ;;  %v317_v24 = vpop.permute.xlu0 %316 }
  0xc1   : > { %vm403_vm10 = vcmp.eq.s32.totalorder %v1307_v37, %v365_v23  ;;  %vm387_vm11 = vcmp.eq.s32.totalorder %v1307_v37, %v317_v24 }
  0xc2   : > { %v1076_v25 = vsel %vm403_vm10, 1.0, %v1227_v40  ;;  %v1060_v26 = vsel %vm387_vm11, 1.0, %v1227_v40 }
  0xc3   : > { %1170 = vmatprep.mubr.msk.f32.mxu0 %vm473_vm0, %v1060_v26  ;;  %1194 = vmatprep.mubr.msk.f32.mxu1 %vm473_vm0, %v1076_v25  ;;  %v863_v26 = vld [vmem:[%s1415_s5 + $0x20] sm:$0xff] }
  0xc4   : > { %v368_v27 = vpop.permute.xlu1 %367  ;;  %v320_v28 = vpop.permute.xlu0 %319 }
  0xc5   : > { %vm404_vm12 = vcmp.eq.s32.totalorder %v1307_v37, %v368_v27  ;;  %vm388_vm13 = vcmp.eq.s32.totalorder %v1307_v37, %v320_v28  ;;  %v879_v28 = vld [vmem:[%s1415_s5 + $0xa0] sm:$0xff] }
  0xc6   : > { %v1077_v29 = vsel %vm404_vm12, 1.0, %v1227_v40  ;;  %v1061_v30 = vsel %vm388_vm13, 1.0, %v1227_v40 }
  0xc7   : > { %1171 = vmatmul.mubr.msk.f32.gmra.mrb[12].mxu0 %vm473_vm0, %v1061_v30  ;;  %1195 = vmatmul.mubr.msk.f32.gmra.mrb[12].mxu1 %vm473_vm0, %v1077_v29 }
  0xc8   : > { %v371_v31 = vpop.permute.xlu1 %370  ;;  %v323_v32 = vpop.permute.xlu0 %322 }
  0xc9   : > { %vm405_vm14 = vcmp.eq.s32.totalorder %v1307_v37, %v371_v31  ;;  %vm389_vm15 = vcmp.eq.s32.totalorder %v1307_v37, %v323_v32 }
  0xca   : > { %v1078_v33 = vsel %vm405_vm14, 1.0, %v1227_v40  ;;  %v1062_v34 = vsel %vm389_vm15, 1.0, %v1227_v40 }
  0xcb   : > { %1173 = vmatprep.mubr.msk.f32.mxu0 %vm473_vm0, %v1062_v34  ;;  %1197 = vmatprep.mubr.msk.f32.mxu1 %vm473_vm0, %v1078_v33 }
  0xcc   : > { %v374_v35 = vpop.permute.xlu1 %373  ;;  %v326_v36 = vpop.permute.xlu0 %325 }
  0xcd   : > { %vm406_vm1 = vcmp.eq.s32.totalorder %v1307_v37, %v374_v35  ;;  %vm390_vm2 = vcmp.eq.s32.totalorder %v1307_v37, %v326_v36  ;;  %v796_v37 = vld [vmem:[%s1409_s28 + $0x8] sm:$0xff]  ;;  %v802_v35 = vld [vmem:[%s1409_s28 + $0x38] sm:$0xff] }
  0xce   : > { %v1079_v38 = vsel %vm406_vm1, 1.0, %v1227_v40  ;;  %v1063_v39 = vsel %vm390_vm2, 1.0, %v1227_v40  ;;  %v795_v40 = vld [vmem:[%s1409_s28] sm:$0xff]  ;;  %v818_v36 = vld [vmem:[%s1409_s28 + $0xb8] sm:$0xff] }
  0xcf   : > { %1174 = vmatmul.mubr.msk.f32.gmra.mrb[14].mxu0 %vm473_vm0, %v1063_v39  ;;  %1198 = vmatmul.mubr.msk.f32.gmra.mrb[14].mxu1 %vm473_vm0, %v1079_v38  ;;  %v801_v38 = vld [vmem:[%s1409_s28 + $0x30] sm:$0xff] }
  0xd0   : > { %v817_v39 = vld [vmem:[%s1409_s28 + $0xb0] sm:$0xff] }
 0x167   : > { %v1154_v41 = vpop.f32.mrb[0].mxu0 }
 0x168   : > { %v828_v43 = vadd.f32 %v1154_v41, %v796_v37  ;;  %v636_v44 = vpop.f32.mrb[1].mxu0 }
 0x169   : > { %v827_v46 = vadd.f32 %v795_v40, %v636_v44  ;;  %v866_v40 = vld [vmem:[%s1415_s5 + $0x38] sm:$0xff] }
 0x16a   : > { %v892_v48 = vadd.f32 %v860_v42, %v828_v43  ;;  %v882_v42 = vld [vmem:[%s1415_s5 + $0xb8] sm:$0xff] }
 0x16b   : > { %v891_v50 = vadd.f32 %v859_v45, %v827_v46  ;;  %v1178_v51 = vpop.f32.mrb[0].mxu1  ;;  %v865_v46 = vld [vmem:[%s1415_s5 + $0x30] sm:$0xff] }
 0x16c   : > { %924 = vst [vmem:[%s1425_s8 + $0x8] sm:$0xff] %v892_v48  ;;  %v844_v53 = vadd.f32 %v1178_v51, %v812_v47  ;;  %v716_v54 = vpop.f32.mrb[1].mxu1  ;;  %v881_v48 = vld [vmem:[%s1415_s5 + $0xb0] sm:$0xff] }
 0x16d   : > { %923 = vst [vmem:[%s1425_s8] sm:$0xff] %v891_v50  ;;  %v843_v56 = vadd.f32 %v811_v49, %v716_v54 }
 0x16e   : > { %v908_v57 = vadd.f32 %v876_v52, %v844_v53 }
 0x16f   : > { %v907_v58 = vadd.f32 %v875_v55, %v843_v56  ;;  %v804_v55 = vld [vmem:[%s1409_s28 + $0x48] sm:$0xff] }
 0x170   : > { %940 = vst [vmem:[%s1425_s8 + $0x88] sm:$0xff] %v908_v57  ;;  %v820_v56 = vld [vmem:[%s1409_s28 + $0xc8] sm:$0xff]  ;;  %v803_v57 = vld [vmem:[%s1409_s28 + $0x40] sm:$0xff] }
 0x171   : > { %939 = vst [vmem:[%s1425_s8 + $0x80] sm:$0xff] %v907_v58  ;;  %v819_v58 = vld [vmem:[%s1409_s28 + $0xc0] sm:$0xff] }
 0x172   : > { %v1157_v63 = vpop.f32.mrb[2].mxu0  ;;  %v1181_v1 = vpop.f32.mrb[2].mxu1 }
 0x173   : > { %v830_v3 = vadd.f32 %v1157_v63, %v798_v59  ;;  %v846_v4 = vadd.f32 %v1181_v1, %v814_v60  ;;  %v646_v5 = vpop.f32.mrb[3].mxu0  ;;  %v726_v7 = vpop.f32.mrb[3].mxu1  ;;  %v868_v60 = vld [vmem:[%s1415_s5 + $0x48] sm:$0xff] }
 0x174   : > { %v829_v9 = vadd.f32 %v797_v61, %v646_v5  ;;  %v845_v10 = vadd.f32 %v813_v62, %v726_v7  ;;  %v884_v62 = vld [vmem:[%s1415_s5 + $0xc8] sm:$0xff] }
 0x175   : > { %v894_v11 = vadd.f32 %v862_v0, %v830_v3  ;;  %v910_v12 = vadd.f32 %v878_v2, %v846_v4  ;;  %v867_v2 = vld [vmem:[%s1415_s5 + $0x40] sm:$0xff] }
 0x176   : > { %v893_v13 = vadd.f32 %v861_v6, %v829_v9  ;;  %v909_v14 = vadd.f32 %v877_v8, %v845_v10  ;;  %v883_v4 = vld [vmem:[%s1415_s5 + $0xc0] sm:$0xff] }
 0x177   : > { %926 = vst [vmem:[%s1425_s8 + $0x18] sm:$0xff] %v894_v11  ;;  %942 = vst [vmem:[%s1425_s8 + $0x98] sm:$0xff] %v910_v12  ;;  %v806_v11 = vld [vmem:[%s1409_s28 + $0x58] sm:$0xff] }
 0x178   : > { %925 = vst [vmem:[%s1425_s8 + $0x10] sm:$0xff] %v893_v13  ;;  %941 = vst [vmem:[%s1425_s8 + $0x90] sm:$0xff] %v909_v14  ;;  %v822_v12 = vld [vmem:[%s1409_s28 + $0xd8] sm:$0xff]  ;;  %v805_v13 = vld [vmem:[%s1409_s28 + $0x50] sm:$0xff] }
 0x179   : > { %v821_v14 = vld [vmem:[%s1409_s28 + $0xd0] sm:$0xff] }
 0x17a   : > { %v1160_v19 = vpop.f32.mrb[4].mxu0  ;;  %v1184_v21 = vpop.f32.mrb[4].mxu1 }
 0x17b   : > { %v832_v23 = vadd.f32 %v1160_v19, %v800_v15  ;;  %v848_v24 = vadd.f32 %v1184_v21, %v816_v16  ;;  %v656_v25 = vpop.f32.mrb[5].mxu0  ;;  %v736_v27 = vpop.f32.mrb[5].mxu1  ;;  %v870_v16 = vld [vmem:[%s1415_s5 + $0x58] sm:$0xff] }
 0x17c   : > { %v831_v29 = vadd.f32 %v799_v17, %v656_v25  ;;  %v847_v30 = vadd.f32 %v815_v18, %v736_v27  ;;  %v886_v18 = vld [vmem:[%s1415_s5 + $0xd8] sm:$0xff] }
 0x17d   : > { %v896_v31 = vadd.f32 %v864_v20, %v832_v23  ;;  %v912_v32 = vadd.f32 %v880_v22, %v848_v24  ;;  %v869_v22 = vld [vmem:[%s1415_s5 + $0x50] sm:$0xff] }
 0x17e   : > { %v895_v33 = vadd.f32 %v863_v26, %v831_v29  ;;  %v911_v34 = vadd.f32 %v879_v28, %v847_v30  ;;  %v885_v24 = vld [vmem:[%s1415_s5 + $0xd0] sm:$0xff] }
 0x17f   : > { %928 = vst [vmem:[%s1425_s8 + $0x28] sm:$0xff] %v896_v31  ;;  %944 = vst [vmem:[%s1425_s8 + $0xa8] sm:$0xff] %v912_v32  ;;  %v808_v31 = vld [vmem:[%s1409_s28 + $0x68] sm:$0xff] }
 0x180   : > { %927 = vst [vmem:[%s1425_s8 + $0x20] sm:$0xff] %v895_v33  ;;  %943 = vst [vmem:[%s1425_s8 + $0xa0] sm:$0xff] %v911_v34  ;;  %v824_v32 = vld [vmem:[%s1409_s28 + $0xe8] sm:$0xff]  ;;  %v807_v33 = vld [vmem:[%s1409_s28 + $0x60] sm:$0xff] }
 0x181   : > { %v823_v34 = vld [vmem:[%s1409_s28 + $0xe0] sm:$0xff] }
 0x182   : > { %v1163_v37 = vpop.f32.mrb[6].mxu0  ;;  %v1187_v41 = vpop.f32.mrb[6].mxu1 }
 0x183   : > { %v834_v43 = vadd.f32 %v1163_v37, %v802_v35  ;;  %v850_v44 = vadd.f32 %v1187_v41, %v818_v36  ;;  %v666_v45 = vpop.f32.mrb[7].mxu0  ;;  %v746_v47 = vpop.f32.mrb[7].mxu1  ;;  %v872_v36 = vld [vmem:[%s1415_s5 + $0x68] sm:$0xff] }
 0x184   : > { %v833_v49 = vadd.f32 %v801_v38, %v666_v45  ;;  %v849_v50 = vadd.f32 %v817_v39, %v746_v47  ;;  %v888_v39 = vld [vmem:[%s1415_s5 + $0xe8] sm:$0xff] }
 0x185   : > { %v898_v51 = vadd.f32 %v866_v40, %v834_v43  ;;  %v914_v52 = vadd.f32 %v882_v42, %v850_v44  ;;  %v871_v42 = vld [vmem:[%s1415_s5 + $0x60] sm:$0xff] }
 0x186   : > { %v897_v53 = vadd.f32 %v865_v46, %v833_v49  ;;  %v913_v54 = vadd.f32 %v881_v48, %v849_v50  ;;  %v887_v44 = vld [vmem:[%s1415_s5 + $0xe0] sm:$0xff] }
 0x187   : > { %930 = vst [vmem:[%s1425_s8 + $0x38] sm:$0xff] %v898_v51  ;;  %946 = vst [vmem:[%s1425_s8 + $0xb8] sm:$0xff] %v914_v52  ;;  %v810_v51 = vld [vmem:[%s1409_s28 + $0x78] sm:$0xff] }
 0x188   : > { %929 = vst [vmem:[%s1425_s8 + $0x30] sm:$0xff] %v897_v53  ;;  %945 = vst [vmem:[%s1425_s8 + $0xb0] sm:$0xff] %v913_v54  ;;  %v826_v52 = vld [vmem:[%s1409_s28 + $0xf8] sm:$0xff]  ;;  %v809_v53 = vld [vmem:[%s1409_s28 + $0x70] sm:$0xff] }
 0x189   : > { %v825_v54 = vld [vmem:[%s1409_s28 + $0xf0] sm:$0xff] }
 0x18a   : > { %v1166_v59 = vpop.f32.mrb[8].mxu0  ;;  %v1190_v61 = vpop.f32.mrb[8].mxu1 }
 0x18b   : > { %v836_v63 = vadd.f32 %v1166_v59, %v804_v55  ;;  %v852_v0 = vadd.f32 %v1190_v61, %v820_v56  ;;  %v676_v1 = vpop.f32.mrb[9].mxu0  ;;  %v756_v3 = vpop.f32.mrb[9].mxu1  ;;  %v874_v56 = vld [vmem:[%s1415_s5 + $0x78] sm:$0xff] }
 0x18c   : > { %v835_v5 = vadd.f32 %v803_v57, %v676_v1  ;;  %v851_v6 = vadd.f32 %v819_v58, %v756_v3  ;;  %v890_v58 = vld [vmem:[%s1415_s5 + $0xf8] sm:$0xff] }
 0x18d   : > { %v900_v7 = vadd.f32 %v868_v60, %v836_v63  ;;  %v916_v8 = vadd.f32 %v884_v62, %v852_v0  ;;  %v873_v62 = vld [vmem:[%s1415_s5 + $0x70] sm:$0xff] }
 0x18e   : > { %v899_v9 = vadd.f32 %v867_v2, %v835_v5  ;;  %v915_v10 = vadd.f32 %v883_v4, %v851_v6  ;;  %v889_v0 = vld [vmem:[%s1415_s5 + $0xf0] sm:$0xff] }
 0x18f   : > { %932 = vst [vmem:[%s1425_s8 + $0x48] sm:$0xff] %v900_v7  ;;  %948 = vst [vmem:[%s1425_s8 + $0xc8] sm:$0xff] %v916_v8 }
 0x190   : > { %931 = vst [vmem:[%s1425_s8 + $0x40] sm:$0xff] %v899_v9  ;;  %947 = vst [vmem:[%s1425_s8 + $0xc0] sm:$0xff] %v915_v10 }
 0x192   : > { %v1169_v15 = vpop.f32.mrb[10].mxu0  ;;  %v1193_v17 = vpop.f32.mrb[10].mxu1 }
 0x193   : > { %v838_v19 = vadd.f32 %v1169_v15, %v806_v11  ;;  %v854_v20 = vadd.f32 %v1193_v17, %v822_v12  ;;  %v686_v21 = vpop.f32.mrb[11].mxu0  ;;  %v766_v23 = vpop.f32.mrb[11].mxu1 }
 0x194   : > { %v837_v25 = vadd.f32 %v805_v13, %v686_v21  ;;  %v853_v26 = vadd.f32 %v821_v14, %v766_v23 }
 0x195   : > { %v902_v27 = vadd.f32 %v870_v16, %v838_v19  ;;  %v918_v28 = vadd.f32 %v886_v18, %v854_v20 }
 0x196   : > { %v901_v29 = vadd.f32 %v869_v22, %v837_v25  ;;  %v917_v30 = vadd.f32 %v885_v24, %v853_v26 }
 0x197   : > { %934 = vst [vmem:[%s1425_s8 + $0x58] sm:$0xff] %v902_v27  ;;  %950 = vst [vmem:[%s1425_s8 + $0xd8] sm:$0xff] %v918_v28 }
 0x198   : > { %933 = vst [vmem:[%s1425_s8 + $0x50] sm:$0xff] %v901_v29  ;;  %949 = vst [vmem:[%s1425_s8 + $0xd0] sm:$0xff] %v917_v30 }
 0x19a   : > { %v1172_v35 = vpop.f32.mrb[12].mxu0  ;;  %v1196_v38 = vpop.f32.mrb[12].mxu1 }
 0x19b   : > { %v840_v37 = vadd.f32 %v1172_v35, %v808_v31  ;;  %v856_v40 = vadd.f32 %v1196_v38, %v824_v32  ;;  %v696_v41 = vpop.f32.mrb[13].mxu0  ;;  %v776_v43 = vpop.f32.mrb[13].mxu1 }
 0x19c   : > { %v839_v45 = vadd.f32 %v807_v33, %v696_v41  ;;  %v855_v46 = vadd.f32 %v823_v34, %v776_v43 }
 0x19d   : > { %v904_v47 = vadd.f32 %v872_v36, %v840_v37  ;;  %v920_v48 = vadd.f32 %v888_v39, %v856_v40 }
 0x19e   : > { %v903_v49 = vadd.f32 %v871_v42, %v839_v45  ;;  %v919_v50 = vadd.f32 %v887_v44, %v855_v46 }
 0x19f   : > { %936 = vst [vmem:[%s1425_s8 + $0x68] sm:$0xff] %v904_v47  ;;  %952 = vst [vmem:[%s1425_s8 + $0xe8] sm:$0xff] %v920_v48 }
 0x1a0   : > { %935 = vst [vmem:[%s1425_s8 + $0x60] sm:$0xff] %v903_v49  ;;  %951 = vst [vmem:[%s1425_s8 + $0xe0] sm:$0xff] %v919_v50 }
 0x1a2   : > { %v1175_v55 = vpop.f32.mrb[14].mxu0  ;;  %v1199_v57 = vpop.f32.mrb[14].mxu1 }
 0x1a3   : > { %v842_v59 = vadd.f32 %v1175_v55, %v810_v51  ;;  %v858_v60 = vadd.f32 %v1199_v57, %v826_v52  ;;  %v706_v61 = vpop.f32.mrb[15].mxu0  ;;  %v786_v63 = vpop.f32.mrb[15].mxu1 }
 0x1a4   : > { %v841_v1 = vadd.f32 %v809_v53, %v706_v61  ;;  %v857_v2 = vadd.f32 %v825_v54, %v786_v63 }
 0x1a5   : > { %v906_v3 = vadd.f32 %v874_v56, %v842_v59  ;;  %v922_v4 = vadd.f32 %v890_v58, %v858_v60 }
 0x1a6   : > { %v905_v5 = vadd.f32 %v873_v62, %v841_v1  ;;  %v921_v6 = vadd.f32 %v889_v0, %v857_v2 }
 0x1a7   : > { %938 = vst [vmem:[%s1425_s8 + $0x78] sm:$0xff] %v906_v3  ;;  %954 = vst [vmem:[%s1425_s8 + $0xf8] sm:$0xff] %v922_v4 }
 0x1a8   : > { %937 = vst [vmem:[%s1425_s8 + $0x70] sm:$0xff] %v905_v5  ;;  %953 = vst [vmem:[%s1425_s8 + $0xf0] sm:$0xff] %v921_v6 }
 0x1a9 PF: > { %s14_s15 = sadd.s32 1, %s1224_s15  }
 0x1aa   : > { %p11_p4 = scmp.ge.s32.totalorder %s14_s15, 4  }
 0x1ac   :  { %13 = sbr.rel (!%p11_p4) target bundleno = 1 (0x1), region = 72 }

</bundles_post_ra>
